<compile_context>
chip_gen: v7x
topology: tpu7x:2x2x1
jax: 0.10.0
libtpu: 0.0.40
codegen_flags: <defaults>
</compile_context>

<pallas_src>
import functools

import jax
import jax.numpy as jnp
from jax.experimental import pallas as pl
from jax.experimental.pallas import tpu as pltpu


# ---------------------------------------------------------------------------
# Fused kernel.
#   xflat_ref : (N*C*B, W)   patches, time-major rows  (n, c, b)
#   dec_ref   : (M*C*B, d)   decoder inputs (month ++ channel), rows (m, c, b)
#   wenc_ref  : (2d+W+2, d)  [enc_wih^T ; enc_whh^T ; wp^T ; bp ; bih+bhh]
#   wdec_ref  : (2d+1, d)    [dec_wih^T ; dec_whh^T ; dec_bih+dec_bhh]
#   wre_ref   : (d+2, W)     [wre^T ; bre ; bdr (broadcast row)]
#   p_ref     : (B, C*B)     kron(wdr, I_B) channel-projection matrix ('single')
#   out_ref   : (B, pred_len) for 'single', (C*B, pred_len) for 'multi'
# ---------------------------------------------------------------------------
def fused_segrnn_kernel(xflat_ref, dec_ref, wenc_ref, wdec_ref, wre_ref, *rest,
                        B, C, N, M, W, d, single):
    if single:
        p_ref, out_ref = rest
    else:
        (out_ref,) = rest
    CB = C * B
    f32 = jnp.float32

    # ---- unpack packed weights (static ref slices; paired biases pre-summed) --
    wih_t = wenc_ref[0:d, :]
    whh_t = wenc_ref[d:2 * d, :]
    wp_t = wenc_ref[2 * d:2 * d + W, :]
    bp = wenc_ref[2 * d + W:2 * d + W + 1, :]
    b_enc = wenc_ref[2 * d + W + 1:2 * d + W + 2, :]          # bih + bhh
    dwih_t = wdec_ref[0:d, :]
    dwhh_t = wdec_ref[d:2 * d, :]
    b_dec = wdec_ref[2 * d:2 * d + 1, :]                      # dec_bih + dec_bhh
    wre_t = wre_ref[0:d, :]
    bre = wre_ref[d:d + 1, :]
    bdr = wre_ref[d + 1:d + 2, :]
    cdt = wih_t.dtype                                         # MXU operand dtype

    # ---- encoder: non-recurrent matmuls hoisted & batched over all N steps ----
    e_all = jnp.maximum(
        jnp.dot(xflat_ref[...], wp_t, preferred_element_type=f32) + bp, 0.0)
    g_all = jnp.dot(e_all.astype(cdt), wih_t, preferred_element_type=f32) + b_enc

    # recurrent part: one matmul + tanh per step (N is small & static -> unrolled)
    # TODO(synk): for large N switch to lax.fori_loop + VMEM scratch for g_all.
    h = jnp.zeros((CB, d), f32)
    for t in range(N):
        g_t = g_all[t * CB:(t + 1) * CB, :]
        h = jnp.tanh(g_t + jnp.dot(h.astype(cdt), whh_t,
                                   preferred_element_type=f32))

    # ---- decoder (seq_len == 1): fully batched over all M patches -------------
    dw_all = jnp.dot(dec_ref[...], dwih_t, preferred_element_type=f32) + b_dec   # (M*CB, d)
    hw = jnp.dot(h.astype(cdt), dwhh_t, preferred_element_type=f32)              # (CB, d)
    hw_all = jnp.concatenate([hw] * M, axis=0)                                   # (M*CB, d)
    h_dec = jnp.tanh(dw_all + hw_all)
    # TODO(synk): nn.Dropout is identity in eval mode; training-mode dropout
    # (pltpu.prng_random_bits mask) not implemented.
    yw_all = jnp.dot(h_dec.astype(cdt), wre_t, preferred_element_type=f32) + bre  # (M*CB, W)

    # ---- per-patch output placement (and 'single' channel projection) ---------
    if single:
        p = p_ref[...]
    for m in range(M):
        yw_m = yw_all[m * CB:(m + 1) * CB, :]                                     # (CB, W)
        if single:
            # out[b] = sum_c wdr[c] * yw[(c,b)] + bdr
            yw_m = jnp.dot(p, yw_m, preferred_element_type=f32) + bdr             # (B, W)
        out_ref[:, m * W:(m + 1) * W] = jnp.maximum(yw_m, 0.0)


# ---------------------------------------------------------------------------
# Wrapper: layout glue, embedding gather, weight packing (plain JAX) + 1 call.
# ---------------------------------------------------------------------------
def custom_embedding_seg_rnn(params, configs, output_channel, x, x_mark, y_mark,
                             compute_dtype=jnp.bfloat16):
    del x_mark  # unused in the reference forward
    B, L, C = x.shape
    W = configs["patch_len"]
    N = configs["seq_len"] // W
    M = configs["pred_len"] // W
    d = configs["d_model"]
    pred_len = configs["pred_len"]
    CB = C * B
    single = (output_channel == "single")

    # time-major patch rows: xflat[(n*C + c)*B + b, w] = x[b, n*W + w, c]
    xflat = jnp.transpose(x.reshape(B, N, W, C), (1, 3, 0, 2))
    xflat = xflat.reshape(N * CB, W).astype(compute_dtype)

    # decoder inputs (month gather + channel embedding), rows (m, c, b)
    # NOTE: matches reference -- only the LAST batch row of y_mark selects months,
    # and (y*12) truncates toward zero (assumes marks in [0, 1)).
    idx = (y_mark[..., 1][-1] * 12.0).astype(jnp.int32)                  # (M,)
    month = jnp.broadcast_to(params["month_emb"][idx][:, None, None, :],
                             (M, C, B, d // 2))
    chan = jnp.broadcast_to(params["channel_emb"][None, :, None, :],
                            (M, C, B, d // 2))
    dec_in = jnp.concatenate([month, chan], axis=-1)
    dec_in = dec_in.reshape(M * CB, d).astype(compute_dtype)

    # packed weights (pre-transposed for x @ W^T; paired biases summed)
    wenc = jnp.concatenate([
        params["enc_wih"].T, params["enc_whh"].T, params["wp"].T,
        params["bp"][None, :],
        (params["enc_bih"] + params["enc_bhh"])[None, :],
    ], axis=0).astype(compute_dtype)                                     # (2d+W+2, d)
    wdec = jnp.concatenate([
        params["dec_wih"].T, params["dec_whh"].T,
        (params["dec_bih"] + params["dec_bhh"])[None, :],
    ], axis=0).astype(compute_dtype)                                     # (2d+1, d)
    wre = jnp.concatenate([
        params["wre"].T, params["bre"][None, :],
        jnp.full((1, W), params["bdr"][0], jnp.float32),
    ], axis=0).astype(compute_dtype)                                     # (d+2, W)

    kernel = functools.partial(fused_segrnn_kernel,
                               B=B, C=C, N=N, M=M, W=W, d=d, single=single)
    full = lambda shape: pl.BlockSpec(shape, lambda i: (0,) * len(shape))

    in_arrays = [xflat, dec_in, wenc, wdec, wre]
    if single:
        # P[b, c*B + b'] = wdr[c] * delta(b, b')
        pmat = jnp.kron(params["wdr"].astype(jnp.float32),
                        jnp.eye(B, dtype=jnp.float32))                   # (B, C*B)
        in_arrays.append(pmat)
        out_rows = B
    else:
        out_rows = CB

    out = pl.pallas_call(
        kernel,
        out_shape=jax.ShapeDtypeStruct((out_rows, pred_len), jnp.float32),
        grid=(1,),
        in_specs=[full(a.shape) for a in in_arrays],
        out_specs=full((out_rows, pred_len)),
        # Tiny problem -> single grid step on one core.  For large B*C, add a
        # "parallel" grid axis over CB blocks (2 TCs on v7x) instead.
        compiler_params=pltpu.CompilerParams(
            dimension_semantics=("arbitrary",)),
    )(*in_arrays)

    if single:
        return out                                                       # (B, pred_len)
    # rows are (c, b): (C*B, pred_len) -> (B, pred_len, C)
    return jnp.transpose(out.reshape(C, B, pred_len), (1, 2, 0))


# ---------------------------------------------------------------------------
# Pure-JAX reference (sanity check only; mirrors the PyTorch forward).
# ---------------------------------------------------------------------------
def reference_forward(params, configs, output_channel, x, x_mark, y_mark):
    B, L, C = x.shape
    W = configs["patch_len"]
    N = configs["seq_len"] // W
    M = configs["pred_len"] // W
    d = configs["d_model"]

    xw = jnp.transpose(x, (0, 2, 1)).reshape(B * C, N, W)
    enc_in = jnp.maximum(xw @ params["wp"].T + params["bp"], 0.0)
    h = jnp.zeros((B * C, d), jnp.float32)
    for t in range(N):
        h = jnp.tanh(enc_in[:, t, :] @ params["enc_wih"].T + params["enc_bih"]
                     + h @ params["enc_whh"].T + params["enc_bhh"])
    h0 = jnp.repeat(h, M, axis=0)
    idx = (y_mark[..., 1][-1] * 12.0).astype(jnp.int32)
    month_part = jnp.broadcast_to(params["month_emb"][idx][None],
                                  (B * C, M, d // 2))
    channel_part = jnp.tile(params["channel_emb"][:, None, :], (B, M, 1))
    dec_in = jnp.concatenate([month_part, channel_part], -1).reshape(B * C * M, d)
    hdec = jnp.tanh(dec_in @ params["dec_wih"].T + params["dec_bih"]
                    + h0 @ params["dec_whh"].T + params["dec_bhh"])
    yw = hdec @ params["wre"].T + params["bre"]
    y = jnp.transpose(yw.reshape(B, C, M * W), (0, 2, 1))
    if output_channel == "single":
        y = (y @ params["wdr"].T + params["bdr"])[..., 0]
    return jnp.maximum(y, 0.0)


def init_params(key, configs):
    W = configs["patch_len"]
    M = configs["pred_len"] // W
    C = configs["enc_in"]
    d = configs["d_model"]
    ks = jax.random.split(key, 14)
    n = lambda k, s: (0.1 * jax.random.normal(k, s, jnp.float32))
    return {
        "wp": n(ks[0], (d, W)), "bp": n(ks[1], (d,)),
        "enc_wih": n(ks[2], (d, d)), "enc_whh": n(ks[3], (d, d)),
        "enc_bih": n(ks[4], (d,)), "enc_bhh": n(ks[5], (d,)),
        "dec_wih": n(ks[6], (d, d)), "dec_whh": n(ks[7], (d, d)),
        "dec_bih": n(ks[8], (d,)), "dec_bhh": n(ks[9], (d,)),
        "month_emb": jax.random.normal(ks[10], (12 * M, d // 2), jnp.float32),
        "channel_emb": jax.random.normal(ks[11], (C, d // 2), jnp.float32),
        "wre": n(ks[12], (W, d)), "bre": n(ks[12], (W,)),
        "wdr": n(ks[13], (1, C)), "bdr": n(ks[13], (1,)),
    }


if __name__ == "__main__":
    configs = dict(seq_len=8, pred_len=8, enc_in=4, patch_len=4,
                   d_model=32, dropout=0.1)
    B, C = 2, configs["enc_in"]
    M = configs["pred_len"] // configs["patch_len"]

    key = jax.random.PRNGKey(0)
    kp, kx, kxm, kym = jax.random.split(key, 4)
    params = init_params(kp, configs)

    x = jax.random.normal(kx, (B, configs["seq_len"], C), jnp.float32)
    x_mark = jax.random.normal(kxm, (B, configs["seq_len"], 4), jnp.float32)
    # y_mark feature 1 in [0, 1): month fraction -> index into month_emb
    y_mark = jax.random.uniform(kym, (B, M, 4), jnp.float32)

    fwd_single = jax.jit(lambda p, a, am, ym: custom_embedding_seg_rnn(
        p, configs, "single", a, am, ym))
    fwd_multi = jax.jit(lambda p, a, am, ym: custom_embedding_seg_rnn(
        p, configs, "multi", a, am, ym))

    out_s = fwd_single(params, x, x_mark, y_mark)
    out_m = fwd_multi(params, x, x_mark, y_mark)
    jax.block_until_ready((out_s, out_m))

    assert out_s.shape == (B, configs["pred_len"]), out_s.shape
    assert out_m.shape == (B, configs["pred_len"], C), out_m.shape

    ref_s = reference_forward(params, configs, "single", x, x_mark, y_mark)
    ref_m = reference_forward(params, configs, "multi", x, x_mark, y_mark)
    assert jnp.allclose(out_s, ref_s, rtol=5e-2, atol=5e-2), (
        float(jnp.max(jnp.abs(out_s - ref_s))))
    assert jnp.allclose(out_m, ref_m, rtol=5e-2, atol=5e-2), (
        float(jnp.max(jnp.abs(out_m - ref_m))))

    print("KERNEL_OK")
</pallas_src>

<mosaic_0001>
module attributes {stable_mosaic.version = 11 : i64} {
  func.func @fused_segrnn_kernel(%arg0: i32, %arg1: memref<16x4xbf16, #tpu.memory_space<vmem>>, %arg2: memref<16x32xbf16, #tpu.memory_space<vmem>>, %arg3: memref<70x32xbf16, #tpu.memory_space<vmem>>, %arg4: memref<65x32xbf16, #tpu.memory_space<vmem>>, %arg5: memref<34x4xbf16, #tpu.memory_space<vmem>>, %arg6: memref<2x8xf32, #tpu.memory_space<vmem>>, %arg7: memref<2x8xf32, #tpu.memory_space<vmem>>) attributes {dimension_semantics = [#tpu.dimension_semantics<arbitrary>], iteration_bounds = array<i64: 1>, scalar_prefetch = 0 : i64, scratch_operands = 0 : i64, tpu.core_type = #tpu.core_type<tc>, window_params = [{pipeline_mode = #tpu.pipeline_mode<synchronous>, transform_indices = @transform_0, window_bounds = array<i64: 16, 4>}, {pipeline_mode = #tpu.pipeline_mode<synchronous>, transform_indices = @transform_1, window_bounds = array<i64: 16, 32>}, {pipeline_mode = #tpu.pipeline_mode<synchronous>, transform_indices = @transform_2, window_bounds = array<i64: 70, 32>}, {pipeline_mode = #tpu.pipeline_mode<synchronous>, transform_indices = @transform_3, window_bounds = array<i64: 65, 32>}, {pipeline_mode = #tpu.pipeline_mode<synchronous>, transform_indices = @transform_4, window_bounds = array<i64: 34, 4>}, {pipeline_mode = #tpu.pipeline_mode<synchronous>, transform_indices = @transform_5, window_bounds = array<i64: 2, 8>}, {pipeline_mode = #tpu.pipeline_mode<synchronous>, transform_indices = @transform_6, window_bounds = array<i64: 2, 8>}]} {
    %c0 = arith.constant 0 : index
    %c0_0 = arith.constant 0 : index
    %0 = vector.load %arg3[%c0, %c0_0] : memref<70x32xbf16, #tpu.memory_space<vmem>>, vector<32x32xbf16>
    %c32 = arith.constant 32 : index
    %c0_1 = arith.constant 0 : index
    %1 = vector.load %arg3[%c32, %c0_1] : memref<70x32xbf16, #tpu.memory_space<vmem>>, vector<32x32xbf16>
    %c64 = arith.constant 64 : index
    %c0_2 = arith.constant 0 : index
    %2 = vector.load %arg3[%c64, %c0_2] : memref<70x32xbf16, #tpu.memory_space<vmem>>, vector<4x32xbf16>
    %c68 = arith.constant 68 : index
    %c0_3 = arith.constant 0 : index
    %3 = vector.load %arg3[%c68, %c0_3] : memref<70x32xbf16, #tpu.memory_space<vmem>>, vector<1x32xbf16>
    %c69 = arith.constant 69 : index
    %c0_4 = arith.constant 0 : index
    %4 = vector.load %arg3[%c69, %c0_4] : memref<70x32xbf16, #tpu.memory_space<vmem>>, vector<1x32xbf16>
    %c0_5 = arith.constant 0 : index
    %c0_6 = arith.constant 0 : index
    %5 = vector.load %arg4[%c0_5, %c0_6] : memref<65x32xbf16, #tpu.memory_space<vmem>>, vector<32x32xbf16>
    %c32_7 = arith.constant 32 : index
    %c0_8 = arith.constant 0 : index
    %6 = vector.load %arg4[%c32_7, %c0_8] : memref<65x32xbf16, #tpu.memory_space<vmem>>, vector<32x32xbf16>
    %c64_9 = arith.constant 64 : index
    %c0_10 = arith.constant 0 : index
    %7 = vector.load %arg4[%c64_9, %c0_10] : memref<65x32xbf16, #tpu.memory_space<vmem>>, vector<1x32xbf16>
    %c0_11 = arith.constant 0 : index
    %c0_12 = arith.constant 0 : index
    %8 = vector.load %arg5[%c0_11, %c0_12] : memref<34x4xbf16, #tpu.memory_space<vmem>>, vector<32x4xbf16>
    %c32_13 = arith.constant 32 : index
    %c0_14 = arith.constant 0 : index
    %9 = vector.load %arg5[%c32_13, %c0_14] : memref<34x4xbf16, #tpu.memory_space<vmem>>, vector<1x4xbf16>
    %c33 = arith.constant 33 : index
    %c0_15 = arith.constant 0 : index
    %10 = vector.load %arg5[%c33, %c0_15] : memref<34x4xbf16, #tpu.memory_space<vmem>>, vector<1x4xbf16>
    %c0_16 = arith.constant 0 : index
    %c0_17 = arith.constant 0 : index
    %11 = vector.load %arg1[%c0_16, %c0_17] : memref<16x4xbf16, #tpu.memory_space<vmem>>, vector<16x4xbf16>
    %cst = arith.constant dense<0.000000e+00> : vector<16x32xf32>
    %12 = tpu.matmul %11, %2, %cst {dimension_numbers = #tpu.dot_dimension_numbers<[1], [0], [0], [1], [0, 0, 1, 1], [], []>} : vector<16x4xbf16>, vector<4x32xbf16>, vector<16x32xf32> -> vector<16x32xf32>
    %13 = arith.extf %3 : vector<1x32xbf16> to vector<1x32xf32>
    %14 = vector.broadcast %13 : vector<1x32xf32> to vector<16x32xf32>
    %15 = arith.addf %12, %14 : vector<16x32xf32>
    %cst_18 = arith.constant 0.000000e+00 : f32
    %16 = vector.broadcast %cst_18 : f32 to vector<16x32xf32>
    %17 = arith.maximumf %15, %16 : vector<16x32xf32>
    %18 = arith.truncf %17 : vector<16x32xf32> to vector<16x32xbf16>
    %cst_19 = arith.constant dense<0.000000e+00> : vector<16x32xf32>
    %19 = tpu.matmul %18, %0, %cst_19 {dimension_numbers = #tpu.dot_dimension_numbers<[1], [0], [0], [1], [0, 0, 1, 1], [], []>} : vector<16x32xbf16>, vector<32x32xbf16>, vector<16x32xf32> -> vector<16x32xf32>
    %20 = arith.extf %4 : vector<1x32xbf16> to vector<1x32xf32>
    %21 = vector.broadcast %20 : vector<1x32xf32> to vector<16x32xf32>
    %22 = arith.addf %19, %21 : vector<16x32xf32>
    %cst_20 = arith.constant 0.000000e+00 : f32
    %23 = vector.broadcast %cst_20 : f32 to vector<8x32xf32>
    %24 = vector.extract_strided_slice %22 {offsets = [0, 0], sizes = [8, 32], strides = [1, 1]} : vector<16x32xf32> to vector<8x32xf32>
    %25 = arith.truncf %23 : vector<8x32xf32> to vector<8x32xbf16>
    %cst_21 = arith.constant dense<0.000000e+00> : vector<8x32xf32>
    %26 = tpu.matmul %25, %1, %cst_21 {dimension_numbers = #tpu.dot_dimension_numbers<[1], [0], [0], [1], [0, 0, 1, 1], [], []>} : vector<8x32xbf16>, vector<32x32xbf16>, vector<8x32xf32> -> vector<8x32xf32>
    %27 = arith.addf %24, %26 : vector<8x32xf32>
    %28 = math.tanh %27 : vector<8x32xf32>
    %29 = vector.extract_strided_slice %22 {offsets = [8, 0], sizes = [8, 32], strides = [1, 1]} : vector<16x32xf32> to vector<8x32xf32>
    %30 = arith.truncf %28 : vector<8x32xf32> to vector<8x32xbf16>
    %cst_22 = arith.constant dense<0.000000e+00> : vector<8x32xf32>
    %31 = tpu.matmul %30, %1, %cst_22 {dimension_numbers = #tpu.dot_dimension_numbers<[1], [0], [0], [1], [0, 0, 1, 1], [], []>} : vector<8x32xbf16>, vector<32x32xbf16>, vector<8x32xf32> -> vector<8x32xf32>
    %32 = arith.addf %29, %31 : vector<8x32xf32>
    %33 = math.tanh %32 : vector<8x32xf32>
    %c0_23 = arith.constant 0 : index
    %c0_24 = arith.constant 0 : index
    %34 = vector.load %arg2[%c0_23, %c0_24] : memref<16x32xbf16, #tpu.memory_space<vmem>>, vector<16x32xbf16>
    %cst_25 = arith.constant dense<0.000000e+00> : vector<16x32xf32>
    %35 = tpu.matmul %34, %5, %cst_25 {dimension_numbers = #tpu.dot_dimension_numbers<[1], [0], [0], [1], [0, 0, 1, 1], [], []>} : vector<16x32xbf16>, vector<32x32xbf16>, vector<16x32xf32> -> vector<16x32xf32>
    %36 = arith.extf %7 : vector<1x32xbf16> to vector<1x32xf32>
    %37 = vector.broadcast %36 : vector<1x32xf32> to vector<16x32xf32>
    %38 = arith.addf %35, %37 : vector<16x32xf32>
    %39 = arith.truncf %33 : vector<8x32xf32> to vector<8x32xbf16>
    %cst_26 = arith.constant dense<0.000000e+00> : vector<8x32xf32>
    %40 = tpu.matmul %39, %6, %cst_26 {dimension_numbers = #tpu.dot_dimension_numbers<[1], [0], [0], [1], [0, 0, 1, 1], [], []>} : vector<8x32xbf16>, vector<32x32xbf16>, vector<8x32xf32> -> vector<8x32xf32>
    %41 = tpu.concatenate %40, %40 in 0 : vector<8x32xf32>, vector<8x32xf32> -> vector<16x32xf32>
    %42 = arith.addf %38, %41 : vector<16x32xf32>
    %43 = math.tanh %42 : vector<16x32xf32>
    %44 = arith.truncf %43 : vector<16x32xf32> to vector<16x32xbf16>
    %cst_27 = arith.constant dense<0.000000e+00> : vector<16x4xf32>
    %45 = tpu.matmul %44, %8, %cst_27 {dimension_numbers = #tpu.dot_dimension_numbers<[1], [0], [0], [1], [0, 0, 1, 1], [], []>} : vector<16x32xbf16>, vector<32x4xbf16>, vector<16x4xf32> -> vector<16x4xf32>
    %46 = arith.extf %9 : vector<1x4xbf16> to vector<1x4xf32>
    %47 = vector.broadcast %46 : vector<1x4xf32> to vector<16x4xf32>
    %48 = arith.addf %45, %47 : vector<16x4xf32>
    %c0_28 = arith.constant 0 : index
    %c0_29 = arith.constant 0 : index
    %49 = vector.load %arg6[%c0_28, %c0_29] : memref<2x8xf32, #tpu.memory_space<vmem>>, vector<2x8xf32>
    %50 = vector.extract_strided_slice %48 {offsets = [0, 0], sizes = [8, 4], strides = [1, 1]} : vector<16x4xf32> to vector<8x4xf32>
    %cst_30 = arith.constant dense<0.000000e+00> : vector<2x4xf32>
    %51 = tpu.matmul %49, %50, %cst_30 {dimension_numbers = #tpu.dot_dimension_numbers<[1], [0], [0], [1], [0, 0, 1, 1], [], []>} : vector<2x8xf32>, vector<8x4xf32>, vector<2x4xf32> -> vector<2x4xf32>
    %52 = arith.extf %10 : vector<1x4xbf16> to vector<1x4xf32>
    %53 = vector.broadcast %52 : vector<1x4xf32> to vector<2x4xf32>
    %54 = arith.addf %51, %53 : vector<2x4xf32>
    %cst_31 = arith.constant 0.000000e+00 : f32
    %55 = vector.broadcast %cst_31 : f32 to vector<2x4xf32>
    %56 = arith.maximumf %54, %55 : vector<2x4xf32>
    %c0_32 = arith.constant 0 : index
    %c0_33 = arith.constant 0 : index
    %57 = vector.load %arg7[%c0_32, %c0_33] : memref<2x8xf32, #tpu.memory_space<vmem>>, vector<2x4xf32>
    tpu.vector_store %arg7[%c0_32, %c0_33], %56 {strides = array<i32>} : memref<2x8xf32, #tpu.memory_space<vmem>>, vector<2x4xf32>,
    %58 = vector.extract_strided_slice %48 {offsets = [8, 0], sizes = [8, 4], strides = [1, 1]} : vector<16x4xf32> to vector<8x4xf32>
    %cst_34 = arith.constant dense<0.000000e+00> : vector<2x4xf32>
    %59 = tpu.matmul %49, %58, %cst_34 {dimension_numbers = #tpu.dot_dimension_numbers<[1], [0], [0], [1], [0, 0, 1, 1], [], []>} : vector<2x8xf32>, vector<8x4xf32>, vector<2x4xf32> -> vector<2x4xf32>
    %60 = arith.extf %10 : vector<1x4xbf16> to vector<1x4xf32>
    %61 = vector.broadcast %60 : vector<1x4xf32> to vector<2x4xf32>
    %62 = arith.addf %59, %61 : vector<2x4xf32>
    %cst_35 = arith.constant 0.000000e+00 : f32
    %63 = vector.broadcast %cst_35 : f32 to vector<2x4xf32>
    %64 = arith.maximumf %62, %63 : vector<2x4xf32>
    %c0_36 = arith.constant 0 : index
    %c4 = arith.constant 4 : index
    %65 = vector.load %arg7[%c0_36, %c4] : memref<2x8xf32, #tpu.memory_space<vmem>>, vector<2x4xf32>
    tpu.vector_store %arg7[%c0_36, %c4], %64 {strides = array<i32>} : memref<2x8xf32, #tpu.memory_space<vmem>>, vector<2x4xf32>,
    return
  }
  func.func @transform_0(%arg0: i32) -> (i32, i32) {
    %c0_i32 = arith.constant 0 : i32
    %c0_i32_0 = arith.constant 0 : i32
    %c0_i32_1 = arith.constant 0 : i32
    return %c0_i32, %c0_i32_0 : i32, i32
  }
  func.func @transform_1(%arg0: i32) -> (i32, i32) {
    %c0_i32 = arith.constant 0 : i32
    %c0_i32_0 = arith.constant 0 : i32
    %c0_i32_1 = arith.constant 0 : i32
    return %c0_i32, %c0_i32_0 : i32, i32
  }
  func.func @transform_2(%arg0: i32) -> (i32, i32) {
    %c0_i32 = arith.constant 0 : i32
    %c0_i32_0 = arith.constant 0 : i32
    %c0_i32_1 = arith.constant 0 : i32
    return %c0_i32, %c0_i32_0 : i32, i32
  }
  func.func @transform_3(%arg0: i32) -> (i32, i32) {
    %c0_i32 = arith.constant 0 : i32
    %c0_i32_0 = arith.constant 0 : i32
    %c0_i32_1 = arith.constant 0 : i32
    return %c0_i32, %c0_i32_0 : i32, i32
  }
  func.func @transform_4(%arg0: i32) -> (i32, i32) {
    %c0_i32 = arith.constant 0 : i32
    %c0_i32_0 = arith.constant 0 : i32
    %c0_i32_1 = arith.constant 0 : i32
    return %c0_i32, %c0_i32_0 : i32, i32
  }
  func.func @transform_5(%arg0: i32) -> (i32, i32) {
    %c0_i32 = arith.constant 0 : i32
    %c0_i32_0 = arith.constant 0 : i32
    %c0_i32_1 = arith.constant 0 : i32
    return %c0_i32, %c0_i32_0 : i32, i32
  }
  func.func @transform_6(%arg0: i32) -> (i32, i32) {
    %c0_i32 = arith.constant 0 : i32
    %c0_i32_0 = arith.constant 0 : i32
    %c0_i32_1 = arith.constant 0 : i32
    return %c0_i32, %c0_i32_0 : i32, i32
  }
}

</mosaic_0001>

<bundles_post_ra>
// kernel: _lambda_.1
= control target key start
LH: loop header
LB: loop body
LE: loop exit
PB: predicated region body
PF: predicated region fallthrough
CT: control target
= control target key end

     0   :  { %vm65_vm0 = vcmask 1041408   ;;  %v797_v1 = vmov 0.0   ;;  %vm798_vm1 = vmmov 0   ;;  %vm61_vm2 = vcmask 31744   ;;  %s944_s0 = inlined_call_operand.vmem [shape: bf16[16,4], index: 0, kind: input, shape index: {}]   ;;  %s945_s1 = inlined_call_operand.vmem [shape: bf16[16,32], index: 1, kind: input, shape index: {}]   ;;  %s946_s2 = inlined_call_operand.vmem [shape: bf16[70,32], index: 2, kind: input, shape index: {}]   ;;  %s947_s3 = inlined_call_operand.vmem [shape: bf16[65,32], index: 3, kind: input, shape index: {}]   ;;  %s948_s4 = inlined_call_operand.vmem [shape: bf16[34,4], index: 4, kind: input, shape index: {}]   ;;  %s949_s5 = inlined_call_operand.vmem [shape: f32[2,8], index: 5, kind: input, shape index: {}]   ;;  %s950_s6 = inlined_call_operand.hbm [shape: f32[2,8], index: 6, kind: output, shape index: {}]  }
   0x1   :  { %v33_v0 = vld [vmem:[%s946_s2 + $0x20] sm:$0x3]  ;;  %684 = vmatprep.subr.bf16.mxu0 %v797_v1  ;;  %686 = vmatprep.mubr.msk.bf16.mxu0 %vm798_vm1, %v797_v1 }
   0x2   :  { %v67_v2 = vsel %vm65_vm0, %v33_v0, 0  ;;  %v753_v3 = vld [vmem:[%s944_s0] sm:$0xff]   ;;  %690 = vmatprep.subr.bf16.mxu1 %v797_v1  ;;  %694 = vmatprep.mubr.msk.bf16.mxu1 %vm798_vm1, %v797_v1 }
   0x3   :  { %685 = vmatpush3.bf16.msra.mxu0 %v67_v2 }
   0x4   :  { %698 = vmatprep.subr.bf16.mxu0 %v797_v1 }
   0x6   :  { %687 = vmatmul.mubr.msk.bf16.vlgmr.msra.gmra.mrb[0].mxu0 %vm61_vm2, %v753_v3 }
   0x7   :  { %702 = vmatprep.mubr.msk.bf16.mxu0 %vm798_vm1, %v797_v1 }
   0x8   :  { %11 = vsyncpa [#allocation3], 0  ;;  %v754_v4 = vld [vmem:[%s946_s2 + $0x10] sm:$0xff]   ;;  %v755_v5 = vld [vmem:[%s946_s2] sm:$0xff]   ;;  %v799_v8 = vmov 0   ;;  %v52_v9 = vlaneseq  ;;  %vm129_vm3 = vcmask 261120  }
   0x9   :  { %699 = vmatpush3.bf16.msra.mxu0 %v754_v4  ;;  %691 = vmatpush3.bf16.msra.mxu1 %v755_v5  ;;  %v756_v6 = vld [vmem:[%s946_s2 + $0x18] sm:$0xff]   ;;  %v757_v7 = vld [vmem:[%s946_s2 + $0x8] sm:$0xff]   ;;  %v34_v11 = vld [vmem:[%s946_s2 + $0x20] sm:$0x4]  ;;  %vm472_vm4 = vcmask 64512   ;;  %vm547_vm5 = vcmask 25600  }
   0xa   :  { %700 = vmatprep.subr.bf16.mxu0 %v797_v1  ;;  %692 = vmatprep.subr.bf16.mxu1 %v797_v1  ;;  %v870_v10 = vshrl.u32 %v52_v9, 7  ;;  %v51_v12 = vunpack.c.l.bf16 %v34_v11  ;;  %v758_v39 = vld [vmem:[%s947_s3] sm:$0xff]   ;;  %v759_v40 = vld [vmem:[%s947_s3 + $0x8] sm:$0xff]   ;;  %v761_v42 = vld [vmem:[%s947_s3 + $0x10] sm:$0xff]   ;;  %vm624_vm6 = vcmask 58400  }
   0xb   :  { %v760_v41 = vld [vmem:[%s945_s1] sm:$0xff]   ;;  %v762_v43 = vld [vmem:[%s947_s3 + $0x18] sm:$0xff]   ;;  %v764_v56 = vld [vmem:[%s948_s4 + $0x8] sm:$0xff]  }
   0xc   :  { %v54_v13 = vsub.s32 4, %v870_v10  ;;  %v115_v28 = vsub.s32 5, %v870_v10  ;;  %v763_v55 = vld [vmem:[%s948_s4] sm:$0xff]   ;;  %v282_v59 = vsub.s32 0, %v870_v10  ;;  %v48_v9 = vld [vmem:[%s948_s4 + $0x10] sm:$0x1] }
   0xd   :  { %701 = vmatpush3.bf16.msra.mxu0 %v756_v6  ;;  %693 = vmatpush3.bf16.msra.mxu1 %v757_v7  ;;  %v43_v57 = vld [vmem:[%s947_s3 + $0x20] sm:$0x1]  ;;  %v406_v11 = vunpack.c.l.bf16 %v48_v9  ;;  %s800_s4 = smov 4  }
   0xe   :  { %714 = vmatprep.subr.bf16.mxu0 %v797_v1  ;;  %706 = vmatprep.subr.bf16.mxu1 %v797_v1  ;;  %v55_v14 = vrot.slane %v51_v12, %v54_v13  ;;  %v116_v29 = vrot.slane %v51_v12, %v115_v28  ;;  %v279_v58 = vunpack.c.l.bf16 %v43_v57 }
   0xf   :  { %v410_v12 = vrot.slane %v406_v11, %v282_v59 }
  0x10   :  { %703 = vmatmul.mubr.bf16.vlgmr.msra.gmra.mrb[4].mxu0 %v799_v8  ;;  %v283_v60 = vrot.slane %v279_v58, %v282_v59 }
  0x11   :  { %718 = vmatprep.mubr.msk.bf16.mxu0 %vm798_vm1, %v797_v1  ;;  %715 = vmatpush3.bf16.msra.mxu0 %v758_v39 }
  0x12   :  { %716 = vmatprep.subr.bf16.mxu0 %v797_v1 }
  0x15   :  { %717 = vmatpush3.bf16.msra.mxu0 %v759_v40 }
  0x16   :  { %730 = vmatprep.subr.bf16.mxu0 %v797_v1 }
  0x18   :  { %719 = vmatmul.mubr.msk.bf16.vlgmr.msra.gmra.mrb[8].mxu0 %vm129_vm3, %v760_v41 }
  0x19   :  { %734 = vmatprep.mubr.msk.bf16.mxu0 %vm798_vm1, %v797_v1  ;;  %731 = vmatpush3.bf16.msra.mxu0 %v763_v55 }
  0x1a   :  { %732 = vmatprep.subr.bf16.mxu0 %v797_v1 }
  0x1d   :  { %733 = vmatpush3.bf16.msra.mxu0 %v764_v56 }
  0x1e   :  { %743 = vmatprep.subr.mxu0 %v797_v1 }
  0xd9   :  { %v103_v15 = vpop.f32.mrb[0].mxu0 }
  0xda   :  { %v104_v16 = vadd.f32 %v103_v15, %v55_v14  ;;  %v688_v17 = vpop.f32.mrb[1].mxu0 }
  0xdb   :  { %v106_v18 = vpop.f32.mrb[2].mxu0 }
  0xdc   :  { %v107_v19 = vadd.f32 %v106_v18, %v55_v14  ;;  %v689_v20 = vpop.f32.mrb[3].mxu0  ;;  %v110_v21 = vmax.f32 %v104_v16, 0.0 }
  0xde   :  { %v111_v22 = vmax.f32 %v107_v19, 0.0  ;;  %v467_v19 = vld [vmem:[%s949_s5] sm:$0x3]  ;;  %s801_s5 = smov [#allocation2]  }
  0xdf   :  { %s632_s27 = sshll.u32 %s801_s5, 4  ;;  %s633_s27 = int_to_ptr.vmem [resolvable:$true] %s632_s27 }
  0xe0   :  { %v112_v23 = vpack.c.bf16 %v111_v22, %v110_v21  ;;  %s773_s0 = scalar_lea.vmem %s633_s27, 32  ;;  %p778_p1 = scmp.lt.s32.totalorder %s633_s27, %s633_s27 }
  0xe1   :  { %p774_p0 = scmp.ne.s32.totalorder %s633_s27, %s773_s0  ;;  %p779_p2 = scmp.lt.s32.totalorder %s773_s0, %s773_s0 }
  0xe2   :  { %695 = vmatmul.mubr.msk.bf16.vlgmr.msra.gmra.mrb[0].mxu1 %vm129_vm3, %v112_v23 }
  0xe3   :  { %707 = vmatpush3.bf16.msra.mxu1 %v754_v4  ;;  %710 = vmatprep.mubr.msk.bf16.mxu1 %vm798_vm1, %v797_v1  ;;  %v223_v24 = vpop.f32.mrb[4].mxu0  ;;  %p780_p3 = por %p779_p2, %p778_p1 }
  0xe4   :  { %708 = vmatprep.subr.bf16.mxu1 %v797_v1  ;;  %v704_v25 = vpop.f32.mrb[5].mxu0 }
  0xe5   :  { %v226_v26 = vpop.f32.mrb[6].mxu0  ;;  %p781_p4 = pnand %p780_p3, %p774_p0 }
  0xe6   :  { %v705_v27 = vpop.f32.mrb[7].mxu0 }
  0xe7   :  { %709 = vmatpush3.bf16.msra.mxu1 %v756_v6 }
  0xe8   :  { %722 = vmatprep.subr.bf16.mxu1 %v797_v1 }
  0xeb   :  { %v338_v51 = vpop.f32.mrb[8].mxu0 }
  0xec   :  { %v720_v52 = vpop.f32.mrb[9].mxu0  ;;  %v339_v61 = vadd.f32 %v338_v51, %v283_v60 }
  0xed   :  { %v341_v53 = vpop.f32.mrb[10].mxu0 }
  0xee   :  { %v721_v54 = vpop.f32.mrb[11].mxu0  ;;  %v342_v62 = vadd.f32 %v341_v53, %v283_v60 }
 0x1b5   :  { %v167_v30 = vpop.f32.mrb[0].mxu1 }
 0x1b6   :  { %v168_v31 = vadd.f32 %v167_v30, %v116_v29  ;;  %v696_v32 = vpop.f32.mrb[1].mxu1 }
 0x1b7   :  { %v170_v33 = vpop.f32.mrb[2].mxu1 }
 0x1b8   :  { %v229_v34 = vadd.f32 %v223_v24, %v168_v31  ;;  %v171_v35 = vadd.f32 %v170_v33, %v116_v29  ;;  %v697_v36 = vpop.f32.mrb[3].mxu1 }
 0x1ba   :  { %765 = vtanh.f32 %v229_v34 }
 0x1c4   :  { %v766_v37 = vpop.eup %765 }
 0x1c5   :  { %v231_v38 = vpack.c.bf16 %v766_v37, %v766_v37 }
 0x1c7   :  { %711 = vmatmul.mubr.msk.bf16.vlgmr.msra.gmra.mrb[4].mxu1 %vm129_vm3, %v231_v38 }
 0x1c8   :  { %726 = vmatprep.mubr.msk.bf16.mxu1 %vm798_vm1, %v797_v1  ;;  %723 = vmatpush3.bf16.msra.mxu1 %v761_v42 }
 0x1c9   :  { %724 = vmatprep.subr.bf16.mxu1 %v797_v1 }
 0x1cc   :  { %725 = vmatpush3.bf16.msra.mxu1 %v762_v43 }
 0x1cd   :  { %738 = vmatprep.subr.mxu1 %v797_v1 }
 0x29a   :  { %v269_v44 = vpop.f32.mrb[4].mxu1 }
 0x29b   :  { %v275_v45 = vadd.f32 %v269_v44, %v171_v35  ;;  %v712_v46 = vpop.f32.mrb[5].mxu1 }
 0x29c   :  { %v272_v47 = vpop.f32.mrb[6].mxu1 }
 0x29d   :  { %767 = vtanh.f32 %v275_v45  ;;  %v713_v48 = vpop.f32.mrb[7].mxu1 }
 0x2a7   :  { %v768_v49 = vpop.eup %767 }
 0x2a8   :  { %v345_v50 = vpack.c.bf16 %v768_v49, %v768_v49 }
 0x2aa   :  { %727 = vmatmul.mubr.msk.bf16.vlgmr.msra.gmra.mrb[8].mxu1 %vm129_vm3, %v345_v50 }
 0x2ab   :  { %740 = vmatprep.mubr.msk.f32.mxu1 %vm798_vm1, %v797_v1 }
 0x37d   :  { %v395_v63 = vpop.f32.mrb[8].mxu1 }
 0x37e   :  { %v401_v0 = vadd.f32 %v395_v63, %v339_v61  ;;  %v402_v2 = vadd.f32 %v395_v63, %v342_v62  ;;  %v728_v3 = vpop.f32.mrb[9].mxu1 }
 0x37f   :  { %v398_v4 = vpop.f32.mrb[10].mxu1 }
 0x380   :  { %769 = vtanh.f32 %v401_v0  ;;  %v729_v5 = vpop.f32.mrb[11].mxu1 }
 0x381   :  { %771 = vtanh.f32 %v402_v2 }
 0x38a   :  { %v770_v6 = vpop.eup %769 }
 0x38b   :  { %v772_v7 = vpop.eup %771 }
 0x38c   :  { %v405_v8 = vpack.c.bf16 %v772_v7, %v770_v6 }
 0x38e   :  { %735 = vmatmul.mubr.msk.bf16.vlgmr.msra.gmra.mrb[12].mxu0 %vm129_vm3, %v405_v8 }
 0x38f   :  { %745 = vmatprep.mubr.msk.f32.mxu0 %vm798_vm1, %v797_v1  ;;  %v470_v1 = vsub.s32 1, %v870_v10 }
 0x391   :  { %v471_v20 = vrot.slane %v406_v11, %v470_v1 }
 0x461   :  { %v460_v13 = vpop.f32.mrb[12].mxu0 }
 0x462   :  { %v461_v14 = vadd.f32 %v460_v13, %v410_v12  ;;  %v736_v15 = vpop.f32.mrb[13].mxu0 }
 0x463   :  { %v463_v16 = vpop.f32.mrb[14].mxu0 }
 0x464   :  { %v464_v17 = vadd.f32 %v463_v16, %v410_v12  ;;  %v737_v18 = vpop.f32.mrb[15].mxu0  ;;  %739 = vmatpush3.msra.mxu1 %v461_v14 }
 0x465   :  { %741 = vmatmul.mubr.msk.f32.vlgmr.msra.gmra.mrb[12].mxu1 %vm472_vm4, %v467_v19 }
 0x466   :  { %744 = vmatpush3.msra.mxu0 %v464_v17 }
 0x467   :  { %746 = vmatmul.mubr.msk.f32.vlgmr.msra.gmra.mrb[16].mxu0 %vm472_vm4, %v467_v19 }
 0x538   :  { %v542_v21 = vpop.f32.mrb[12].mxu1 }
 0x539   :  { %v543_v22 = vadd.f32 %v542_v21, %v471_v20  ;;  %v742_v23 = vpop.f32.mrb[13].mxu1 }
 0x53a   :  { %v615_v24 = vpop.f32.mrb[16].mxu0 }
 0x53b   :  { %v616_v25 = vadd.f32 %v615_v24, %v471_v20  ;;  %v747_v26 = vpop.f32.mrb[17].mxu0  ;;  %v546_v27 = vmax.f32 %v543_v22, 0.0 }
 0x53d   :  { %v619_v28 = vmax.f32 %v616_v25, 0.0  ;;  %548 = vst.msk [vmem:[#allocation2] sm:$0x3] %vm547_vm5, %v546_v27 }
 0x53f   :  { %621 = vrot.lane.b32.xlu0 %v619_v28, %s800_s4 }
 0x5b1   :  { %v622_v29 = vpop.permute.xlu0 %621 }
 0x5b2   :  { %625 = vst.msk [vmem:[#allocation2] sm:$0x3] %vm624_vm6, %v622_v29 }
 0x5b3   :  { %784 = shalt.err (!%p781_p4)
}
 0x5b4   :  { %s785_s30 = scalar_lea.hbm %s950_s6, 32 }
 0x5b5   :  { %p786_p5 = scmp.ne.s32.totalorder %s950_s6, %s785_s30  ;;  %p789_p6 = scmp.lt.u32.totalorder %s785_s30, %s950_s6 }
 0x5b7   :  { %p791_p7 = pnand %p789_p6, %p786_p5 }
 0x5b9   :  { %794 = shalt.err (!%p791_p7)
}
 0x5ba   :  { %635 = dma.vmem_to_hbm [thread:$0]  %s633_s27, 32, %s950_s6, [#allocation3]  }
 0x5bb   :  { %795 = dma.done.wait [#allocation3], 32  }
 0x5bc   :  { %796 = vsyncadd [#allocation3], 4294967264 }
 0x5bd   :  { %639 = vsyncpa [#allocation3], 1 }

</bundles_post_ra>
